<compile_context>
chip_gen: v7x
topology: tpu7x:2x2x1
jax: 0.10.0
libtpu: 0.0.40
codegen_flags: <defaults>
</compile_context>

<pallas_src>
import functools
import math
import types

import jax
import jax.numpy as jnp
from jax.experimental import pallas as pl
from jax.experimental.pallas import tpu as pltpu


_MAX_BLOCK_BYTES = 16 << 20
_MAX_TILE_ROWS = 1024


# ----------------------------- Pallas kernels ------------------------------


def _label_smoothing_kl_kernel(logits_ref, tgt_ref, out_ref, *,
                               n_rows, v_real, ignore_index, confidence,
                               smoothing, plogp_const, ign_in_vocab, tile_n):
    """Per-tile partial of sum_{i,v} p_iv * (log p_iv - log_softmax(x)_iv)."""
    i = pl.program_id(0)
    x = logits_ref[...].astype(jnp.float32)           # (TN, V)
    t = tgt_ref[...]                                  # (TN, 1) int32

    # row mask for the (possibly out-of-bounds) last block
    row = jax.lax.broadcasted_iota(jnp.int32, t.shape, 0) + i * tile_n
    in_bounds = row < n_rows

    # logsumexp along vocab (lane axis)
    m = jnp.max(x, axis=-1, keepdims=True)
    lse = jnp.log(jnp.sum(jnp.exp(x - m), axis=-1, keepdims=True)) + m

    col = jax.lax.broadcasted_iota(jnp.int32, x.shape, 1)
    x_t = jnp.sum(jnp.where(col == t, x, 0.0), axis=-1, keepdims=True)
    sum_x = jnp.sum(x, axis=-1, keepdims=True)
    lp_t = x_t - lse

    # sum over non-target / non-ignore columns of log_softmax
    if ign_in_vocab:
        x_ign = jnp.sum(jnp.where(col == ignore_index, x, 0.0),
                        axis=-1, keepdims=True)
        other = (sum_x - x_t - x_ign) - (v_real - 2) * lse
    else:
        other = (sum_x - x_t) - (v_real - 1) * lse

    cross = confidence * lp_t + smoothing * other
    valid = jnp.logical_and(t != ignore_index, in_bounds)
    row_kl = jnp.where(valid, plogp_const - cross, 0.0)
    out_ref[i] = jnp.sum(row_kl)


def _cross_entropy_kernel(logits_ref, tgt_ref, nll_ref, cnt_ref, *,
                          n_rows, ignore_index, tile_n):
    """Per-tile partials: sum of per-token NLL over valid rows and valid count."""
    i = pl.program_id(0)
    x = logits_ref[...].astype(jnp.float32)
    t = tgt_ref[...]

    row = jax.lax.broadcasted_iota(jnp.int32, t.shape, 0) + i * tile_n
    in_bounds = row < n_rows

    m = jnp.max(x, axis=-1, keepdims=True)
    lse = jnp.log(jnp.sum(jnp.exp(x - m), axis=-1, keepdims=True)) + m

    col = jax.lax.broadcasted_iota(jnp.int32, x.shape, 1)
    x_t = jnp.sum(jnp.where(col == t, x, 0.0), axis=-1, keepdims=True)
    valid = jnp.logical_and(t != ignore_index, in_bounds)
    validf = valid.astype(jnp.float32)
    nll = jnp.where(valid, lse - x_t, 0.0)

    nll_ref[i] = jnp.sum(nll)
    cnt_ref[i] = jnp.sum(validf)


# ----------------------------- tiling / launch ------------------------------


def _round_up(x, m):
    return ((x + m - 1) // m) * m


def _choose_tile_n(n, v, itemsize):
    vp = _round_up(v, 128)                  # physical lane width in VMEM
    rows = _MAX_BLOCK_BYTES // (vp * itemsize)
    rows = max(8, min(_MAX_TILE_ROWS, (rows // 8) * 8))
    return min(rows, _round_up(n, 8))


def _run_partial_kernel(kernel, logits, targets_2d, num_outputs, tile_n):
    N, V = logits.shape
    grid = -(-N // tile_n)
    vp = _round_up(V, 128)
    block_bytes = tile_n * vp * jnp.dtype(logits.dtype).itemsize
    vmem_limit = int(min(56 << 20, max(32 << 20, 2 * block_bytes + (4 << 20))))

    out_shape = tuple(jax.ShapeDtypeStruct((grid,), jnp.float32)
                      for _ in range(num_outputs))
    out_specs = tuple(pl.BlockSpec(memory_space=pltpu.MemorySpace.SMEM)
                      for _ in range(num_outputs))
    if num_outputs == 1:
        out_shape, out_specs = out_shape[0], out_specs[0]

    return pl.pallas_call(
        kernel,
        out_shape=out_shape,
        grid_spec=pltpu.PrefetchScalarGridSpec(
            num_scalar_prefetch=0,
            grid=(grid,),
            in_specs=[pl.BlockSpec((tile_n, V), lambda i: (i, 0)),
                      pl.BlockSpec((tile_n, 1), lambda i: (i, 0))],
            out_specs=out_specs,
        ),
        compiler_params=pltpu.CompilerParams(
            dimension_semantics=("arbitrary",),
            vmem_limit_bytes=vmem_limit),
    )(logits, targets_2d)


# ----------------------------- Module wrappers ------------------------------


class LabelSmoothingLoss:
    def __init__(self, label_smoothing, tgt_vocab_size, ignore_index=-100):
        assert 0.0 < label_smoothing <= 1.0
        self.ignore_index = ignore_index
        self.smoothing = label_smoothing / (tgt_vocab_size - 2)
        self.confidence = 1.0 - label_smoothing

    def _plogp_const(self, v_real, ign_in_vocab):
        # xlogy semantics: 0*log0 == 0
        n_smooth = v_real - 2 if ign_in_vocab else v_real - 1
        c = 0.0
        if self.confidence > 0.0:
            c += self.confidence * math.log(self.confidence)
        if self.smoothing > 0.0:
            c += n_smooth * self.smoothing * math.log(self.smoothing)
        return c

    def __call__(self, output, target):
        N, V = output.shape
        ign_in_vocab = 0 <= self.ignore_index < V
        tile_n = _choose_tile_n(N, V, jnp.dtype(output.dtype).itemsize)
        targets_2d = target.reshape(-1, 1).astype(jnp.int32)
        kernel = functools.partial(
            _label_smoothing_kl_kernel,
            n_rows=N,
            v_real=V,
            ignore_index=self.ignore_index,
            confidence=self.confidence,
            smoothing=self.smoothing,
            plogp_const=self._plogp_const(V, ign_in_vocab),
            ign_in_vocab=ign_in_vocab,
            tile_n=tile_n,
        )
        partials = _run_partial_kernel(kernel, output, targets_2d,
                                       num_outputs=1, tile_n=tile_n)
        return jnp.sum(partials) / N  # F.kl_div(..., reduction='batchmean')

    def plain(self, output, target):
        """Pure-JAX path for tiny inputs (punish_first single row)."""
        x = output.astype(jnp.float32)
        log_probs = jax.nn.log_softmax(x, axis=-1)
        N, V = x.shape
        col = jnp.arange(V)[None, :]
        t = target.reshape(-1).astype(jnp.int32)[:, None]
        p = jnp.where(col == t, self.confidence,
                      jnp.where(col == self.ignore_index, 0.0, self.smoothing))
        p = jnp.where(t != self.ignore_index, p, 0.0)
        plogp = jnp.where(p > 0, p * jnp.log(jnp.where(p > 0, p, 1.0)), 0.0)
        return jnp.sum(plogp - p * log_probs) / N


class CrossEntropyLoss:
    """nn.CrossEntropyLoss(ignore_index=..., reduction='mean')."""

    def __init__(self, ignore_index=-100):
        self.ignore_index = ignore_index

    def __call__(self, output, target):
        N, V = output.shape
        tile_n = _choose_tile_n(N, V, jnp.dtype(output.dtype).itemsize)
        targets_2d = target.reshape(-1, 1).astype(jnp.int32)
        kernel = functools.partial(_cross_entropy_kernel,
                                   n_rows=N,
                                   ignore_index=self.ignore_index,
                                   tile_n=tile_n)
        nll, cnt = _run_partial_kernel(kernel, output, targets_2d,
                                       num_outputs=2, tile_n=tile_n)
        # NaN if every target is ignored -- matches PyTorch semantics.
        return jnp.sum(nll) / jnp.sum(cnt)

    def plain(self, output, target):
        x = output.astype(jnp.float32)
        lse = jax.nn.logsumexp(x, axis=-1)
        t = target.reshape(-1).astype(jnp.int32)
        x_t = jnp.take_along_axis(x, t[:, None], axis=-1)[:, 0]
        valid = (t != self.ignore_index).astype(jnp.float32)
        return jnp.sum((lse - x_t) * valid) / jnp.sum(valid)


class SequenceLoss:
    def __init__(self, label_smoothing, vocab_size, ignore_index=-100,
                 ignore_indices=(), punish_first=False):
        if ignore_indices:
            ignore_index = ignore_indices[0]
        self.ignore_index = ignore_index
        self.ignore_indices = list(ignore_indices)
        self.punish_first = punish_first
        if label_smoothing == 0:
            self.criterion = CrossEntropyLoss(ignore_index=ignore_index)
        else:
            self.criterion = LabelSmoothingLoss(label_smoothing, vocab_size, ignore_index)

    def __call__(self, output, target):
        B, L, V = output.shape
        output = output.reshape(-1, V)
        target = target.reshape(-1)
        for idx in self.ignore_indices:
            if idx != self.ignore_index:
                target = jnp.where(target == idx, self.ignore_index, target)
        if self.punish_first:
            # single-row term in plain JAX; main term in the Pallas kernel
            loss = (10.0 * self.criterion.plain(output[:1, :], target[:1])
                    + self.criterion(output, target))
        else:
            loss = self.criterion(output, target)
        return loss


class Criterion:
    def __init__(self, args, tokenizer):
        fmt = args.format
        tn = tokenizer[fmt]
        self.criterion = {
            fmt: SequenceLoss(args.label_smoothing, len(tn),
                              ignore_index=tn.PAD_ID,
                              punish_first=args.punish_first)
        }

    def __call__(self, results, refs=None):
        losses = {}
        for fmt in results:
            predictions, targets, *_ = results[fmt]
            loss_ = self.criterion[fmt](predictions, targets)
            losses[fmt] = loss_  # already a scalar; PyTorch `.mean()` branch is a no-op
        return losses


# ----------------------------- references (plain JAX) ------------------------


def _ref_label_smoothing_loss(output, target, label_smoothing, vocab_size, ignore_index):
    log_probs = jax.nn.log_softmax(output.astype(jnp.float32), axis=-1)
    smooth = label_smoothing / (vocab_size - 2)
    conf = 1.0 - label_smoothing
    N, V = output.shape
    col = jnp.arange(V)[None, :]
    p = jnp.where(col == target[:, None], conf,
                  jnp.where(col == ignore_index, 0.0, smooth))
    p = jnp.where((target != ignore_index)[:, None], p, 0.0)
    plogp = jnp.where(p > 0, p * jnp.log(jnp.where(p > 0, p, 1.0)), 0.0)
    return jnp.sum(plogp - p * log_probs) / N


def _ref_cross_entropy(output, target, ignore_index):
    x = output.astype(jnp.float32)
    lse = jax.nn.logsumexp(x, axis=-1)
    x_t = jnp.take_along_axis(x, target[:, None], axis=-1)[:, 0]
    valid = (target != ignore_index).astype(jnp.float32)
    return jnp.sum((lse - x_t) * valid) / jnp.sum(valid)


# ----------------------------- main ------------------------------


class _Tokenizer:
    def __init__(self, vocab_size, pad_id):
        self._n = vocab_size
        self.PAD_ID = pad_id

    def __len__(self):
        return self._n


if __name__ == "__main__":
    VOCAB = 32
    PAD_ID = 0
    B, L = 2, 8

    key = jax.random.PRNGKey(0)
    k1, k2 = jax.random.split(key)
    predictions = jax.random.normal(k1, (B, L, VOCAB), dtype=jnp.float32)
    targets = jax.random.randint(k2, (B, L), 0, VOCAB, dtype=jnp.int32)
    targets = targets.at[0, :2].set(PAD_ID)  # ensure some ignored (PAD) positions

    flat_pred = predictions.reshape(-1, VOCAB)
    flat_tgt = targets.reshape(-1)

    # --- label-smoothing path ---
    args_ls = types.SimpleNamespace(format="reaction", label_smoothing=0.1,
                                    punish_first=False)
    tokenizer = {"reaction": _Tokenizer(VOCAB, PAD_ID)}
    crit_ls = Criterion(args_ls, tokenizer)
    loss_ls = jax.block_until_ready(
        crit_ls({"reaction": (predictions, targets)}, refs=None)["reaction"])
    ref_ls = _ref_label_smoothing_loss(flat_pred, flat_tgt, 0.1, VOCAB, PAD_ID)
    assert jnp.allclose(loss_ls, ref_ls, rtol=1e-4, atol=1e-5), (loss_ls, ref_ls)

    # --- cross-entropy path (label_smoothing == 0) ---
    args_ce = types.SimpleNamespace(format="reaction", label_smoothing=0.0,
                                    punish_first=False)
    crit_ce = Criterion(args_ce, tokenizer)
    loss_ce = jax.block_until_ready(
        crit_ce({"reaction": (predictions, targets)}, refs=None)["reaction"])
    ref_ce = _ref_cross_entropy(flat_pred, flat_tgt, PAD_ID)
    assert jnp.allclose(loss_ce, ref_ce, rtol=1e-4, atol=1e-5), (loss_ce, ref_ce)

    # --- punish_first path (single-row term in plain JAX + kernel main term) ---
    args_pf = types.SimpleNamespace(format="reaction", label_smoothing=0.1,
                                    punish_first=True)
    crit_pf = Criterion(args_pf, tokenizer)
    loss_pf = jax.block_until_ready(
        crit_pf({"reaction": (predictions, targets)}, refs=None)["reaction"])
    ref_pf = 10.0 * _ref_label_smoothing_loss(flat_pred[:1], flat_tgt[:1],
                                              0.1, VOCAB, PAD_ID) + ref_ls
    assert jnp.allclose(loss_pf, ref_pf, rtol=1e-4, atol=1e-5), (loss_pf, ref_pf)

    print("KERNEL_OK")
</pallas_src>

<mosaic_0001>
module attributes {stable_mosaic.version = 11 : i64} {
  func.func @_label_smoothing_kl_kernel(%arg0: i32, %arg1: memref<16x32xf32, #tpu.memory_space<vmem>>, %arg2: memref<16x1xi32, #tpu.memory_space<vmem>>, %arg3: memref<1xf32, #tpu.memory_space<smem>>) attributes {dimension_semantics = [#tpu.dimension_semantics<arbitrary>], iteration_bounds = array<i64: 1>, scalar_prefetch = 0 : i64, scratch_operands = 0 : i64, tpu.core_type = #tpu.core_type<tc>, window_params = [{transform_indices = @transform_0, window_bounds = array<i64: 16, 32>}, {transform_indices = @transform_1, window_bounds = array<i64: 16, 1>}, {transform_indices = @transform_2, window_bounds = array<i64: 1>}]} {
    %c0 = arith.constant 0 : index
    %c0_0 = arith.constant 0 : index
    %0 = vector.load %arg1[%c0, %c0_0] : memref<16x32xf32, #tpu.memory_space<vmem>>, vector<16x32xf32>
    %c0_1 = arith.constant 0 : index
    %c0_2 = arith.constant 0 : index
    %1 = vector.load %arg2[%c0_1, %c0_2] : memref<16x1xi32, #tpu.memory_space<vmem>>, vector<16x1xi32>
    %2 = tpu.iota {dimensions = array<i32: 0>} : vector<16x1xi32>
    %c16_i32 = arith.constant 16 : i32
    %3 = arith.muli %arg0, %c16_i32 : i32
    %4 = vector.broadcast %3 : i32 to vector<16x1xi32>
    %5 = arith.addi %2, %4 : vector<16x1xi32>
    %c16_i32_3 = arith.constant 16 : i32
    %6 = vector.broadcast %c16_i32_3 : i32 to vector<16x1xi32>
    %7 = arith.cmpi slt, %5, %6 : vector<16x1xi32>
    %cst = arith.constant dense<0xFF800000> : vector<16xf32>
    %8 = vector.multi_reduction <maximumf>, %0, %cst [1] : vector<16x32xf32> to vector<16xf32>
    %9 = vector.shape_cast %8 : vector<16xf32> to vector<16x1xf32>
    %10 = vector.broadcast %9 : vector<16x1xf32> to vector<16x32xf32>
    %11 = arith.subf %0, %10 : vector<16x32xf32>
    %12 = math.exp %11 : vector<16x32xf32>
    %cst_4 = arith.constant dense<0.000000e+00> : vector<16xf32>
    %13 = vector.multi_reduction <add>, %12, %cst_4 [1] : vector<16x32xf32> to vector<16xf32>
    %14 = vector.shape_cast %13 : vector<16xf32> to vector<16x1xf32>
    %15 = math.log %14 : vector<16x1xf32>
    %16 = arith.addf %15, %9 : vector<16x1xf32>
    %17 = tpu.iota {dimensions = array<i32: 1>} : vector<16x32xi32>
    %18 = vector.broadcast %1 : vector<16x1xi32> to vector<16x32xi32>
    %19 = arith.cmpi eq, %17, %18 : vector<16x32xi32>
    %cst_5 = arith.constant 0.000000e+00 : f32
    %20 = vector.broadcast %cst_5 : f32 to vector<16x32xf32>
    %21 = arith.select %19, %0, %20 : vector<16x32xi1>, vector<16x32xf32>
    %cst_6 = arith.constant dense<0.000000e+00> : vector<16xf32>
    %22 = vector.multi_reduction <add>, %21, %cst_6 [1] : vector<16x32xf32> to vector<16xf32>
    %23 = vector.shape_cast %22 : vector<16xf32> to vector<16x1xf32>
    %cst_7 = arith.constant dense<0.000000e+00> : vector<16xf32>
    %24 = vector.multi_reduction <add>, %0, %cst_7 [1] : vector<16x32xf32> to vector<16xf32>
    %25 = vector.shape_cast %24 : vector<16xf32> to vector<16x1xf32>
    %26 = arith.subf %23, %16 : vector<16x1xf32>
    %c0_i32 = arith.constant 0 : i32
    %27 = vector.broadcast %c0_i32 : i32 to vector<16x32xi32>
    %28 = arith.cmpi eq, %17, %27 : vector<16x32xi32>
    %cst_8 = arith.constant 0.000000e+00 : f32
    %29 = vector.broadcast %cst_8 : f32 to vector<16x32xf32>
    %30 = arith.select %28, %0, %29 : vector<16x32xi1>, vector<16x32xf32>
    %cst_9 = arith.constant dense<0.000000e+00> : vector<16xf32>
    %31 = vector.multi_reduction <add>, %30, %cst_9 [1] : vector<16x32xf32> to vector<16xf32>
    %32 = vector.shape_cast %31 : vector<16xf32> to vector<16x1xf32>
    %33 = arith.subf %25, %23 : vector<16x1xf32>
    %34 = arith.subf %33, %32 : vector<16x1xf32>
    %cst_10 = arith.constant 3.000000e+01 : f32
    %35 = vector.broadcast %cst_10 : f32 to vector<16x1xf32>
    %36 = arith.mulf %35, %16 : vector<16x1xf32>
    %37 = arith.subf %34, %36 : vector<16x1xf32>
    %cst_11 = arith.constant 0.899999976 : f32
    %38 = vector.broadcast %cst_11 : f32 to vector<16x1xf32>
    %39 = arith.mulf %38, %26 : vector<16x1xf32>
    %cst_12 = arith.constant 0.00333333341 : f32
    %40 = vector.broadcast %cst_12 : f32 to vector<16x1xf32>
    %41 = arith.mulf %40, %37 : vector<16x1xf32>
    %42 = arith.addf %39, %41 : vector<16x1xf32>
    %c0_i32_13 = arith.constant 0 : i32
    %43 = vector.broadcast %c0_i32_13 : i32 to vector<16x1xi32>
    %44 = arith.cmpi ne, %1, %43 : vector<16x1xi32>
    %45 = arith.andi %44, %7 : vector<16x1xi1>
    %cst_14 = arith.constant -0.665202737 : f32
    %46 = vector.broadcast %cst_14 : f32 to vector<16x1xf32>
    %47 = arith.subf %46, %42 : vector<16x1xf32>
    %cst_15 = arith.constant 0.000000e+00 : f32
    %48 = vector.broadcast %cst_15 : f32 to vector<16x1xf32>
    %49 = arith.select %45, %47, %48 : vector<16x1xi1>, vector<16x1xf32>
    %50 = vector.shape_cast %49 : vector<16x1xf32> to vector<1x16x1xf32>
    %cst_16 = arith.constant dense<0.000000e+00> : vector<1xf32>
    %51 = vector.multi_reduction <add>, %50, %cst_16 [1, 2] : vector<1x16x1xf32> to vector<1xf32>
    %52 = vector.shape_cast %51 : vector<1xf32> to vector<1x1x1xf32>
    %53 = vector.extract %52[0, 0, 0] : f32 from vector<1x1x1xf32>
    %54 = arith.index_cast %arg0 : i32 to index
    %55 = memref.load %arg3[%54] : memref<1xf32, #tpu.memory_space<smem>>
    memref.store %53, %arg3[%54] : memref<1xf32, #tpu.memory_space<smem>>
    return
  }
  func.func @transform_0(%arg0: i32) -> (i32, i32) {
    %c0_i32 = arith.constant 0 : i32
    %c0_i32_0 = arith.constant 0 : i32
    return %arg0, %c0_i32 : i32, i32
  }
  func.func @transform_1(%arg0: i32) -> (i32, i32) {
    %c0_i32 = arith.constant 0 : i32
    %c0_i32_0 = arith.constant 0 : i32
    return %arg0, %c0_i32 : i32, i32
  }
  func.func @transform_2(%arg0: i32) -> i32 {
    %c0_i32 = arith.constant 0 : i32
    %c0_i32_0 = arith.constant 0 : i32
    return %c0_i32 : i32
  }
}

</mosaic_0001>

<bundles_post_ra>
// kernel: tpu_custom_call.1
= control target key start
LH: loop header
LB: loop body
LE: loop exit
PB: predicated region body
PF: predicated region fallthrough
CT: control target
= control target key end

     0   :  { %vm25_vm0 = vcmask 261120   ;;  %v161_v4 = vmov 0   ;;  %s220_s0 = inlined_call_operand.vmem [shape: f32[16,32], index: 0, kind: input, shape index: {}]   ;;  %s221_s1 = inlined_call_operand.vmem [shape: s32[16,1], index: 1, kind: input, shape index: {}]   ;;  %s222_s2 = inlined_call_operand.hbm [shape: f32[1], index: 2, kind: output, shape index: {}]  }
   0x1   :  { %v12_v0 = vld [vmem:[%s220_s0] sm:$0xff]  ;;  %v13_v1 = vld [vmem:[%s220_s0 + $0x8] sm:$0xff]  ;;  %139 = vset.pattern.permute.xlu1 %v161_v4  ;;  %140 = vset.pattern.permute.xlu0 %v161_v4 }
   0x2   :  { %v187_v2 = vld [vmem:[%s221_s1] sm:$0xff]  ;;  %v26_v3 = vsel %vm25_vm0, %v12_v0, -inf }
   0x3   :  { %7 = vsyncpa [#allocation3], 0  ;;  %27 = vmax.xlane.f32.xlu0 %v26_v3  ;;  %53 = vperm.xlu1 %139, %v187_v2   ;;  %v29_v5 = vsel %vm25_vm0, %v13_v1, -inf  ;;  %v195_v6 = vld [vmem:[%s221_s1 + $0x8] sm:$0xff]  ;;  %v50_v11 = vlaneseq  ;;  %v68_v25 = vsel %vm25_vm0, %v12_v0, 0.0  ;;  %v71_v26 = vsel %vm25_vm0, %v13_v1, 0.0 }
   0x4   :  { %vm99_vm4 = vcmp.ne.s32.totalorder %v187_v2, 0  ;;  %vm100_vm5 = vcmp.ne.s32.totalorder %v195_v6, 0  ;;  %vm107_vm6 = vcmask 7168   ;;  %s149_s18 = scalar_lea.hbm %s222_s2, 16 }
   0x5   :  { %v51_v14 = vand.u32 127, %v50_v11  ;;  %p150_p0 = scmp.ne.s32.totalorder %s222_s2, %s149_s18  ;;  %p153_p1 = scmp.lt.u32.totalorder %s149_s18, %s222_s2 }
   0x7   :  { %30 = vmax.xlane.f32.xlu0 %v29_v5  ;;  %56 = vperm.xlu1 %139, %v195_v6   ;;  %vm76_vm3 = vcmp.eq.s32.totalorder %v51_v14, 0  ;;  %p155_p2 = pnand %p153_p1, %p150_p0 }
   0x8   :  { %v77_v27 = vsel %vm76_vm3, %v12_v0, 0.0  ;;  %v78_v29 = vsel %vm76_vm3, %v13_v1, 0.0 }
   0x9   :  { %v79_v28 = vsel %vm25_vm0, %v77_v27, 0.0  ;;  %v82_v30 = vsel %vm25_vm0, %v78_v29, 0.0 }
  0x82   :  { %v54_v15 = vpop.permute.xlu1 %53 }
  0x83   :  { %vm58_vm1 = vcmp.eq.s32.totalorder %v51_v14, %v54_v15 }
  0x84   :  { %v60_v18 = vsel %vm58_vm1, %v12_v0, 0.0 }
  0x85   :  { %v62_v20 = vsel %vm25_vm0, %v60_v18, 0.0 }
  0x86   :  { %v57_v17 = vpop.permute.xlu1 %56 }
  0x87   :  { %vm59_vm2 = vcmp.eq.s32.totalorder %v51_v14, %v57_v17 }
  0x88   :  { %v61_v23 = vsel %vm59_vm2, %v13_v1, 0.0 }
  0x89   :  { %v65_v24 = vsel %vm25_vm0, %v61_v23, 0.0 }
  0x90   :  { %v28_v7 = vpop.xlane.xlu0 %27 }
  0x91   :  { %v32_v8 = vsub.f32 %v12_v0, %v28_v7 }
  0x93   :  { %v34_v9 = vmul.f32 1.442695, %v32_v8 }
  0x94   :  { %v31_v10 = vpop.xlane.xlu0 %30 }
  0x95   :  { %141 = vpow2.f32 %v34_v9  ;;  %v33_v12 = vsub.f32 %v13_v1, %v31_v10 }
  0x97   :  { %v36_v13 = vmul.f32 1.442695, %v33_v12 }
  0x99   :  { %143 = vpow2.f32 %v36_v13 }
  0x9f   :  { %v142_v16 = vpop.eup %141 }
  0xa0   :  { %v38_v19 = vsel %vm25_vm0, %v142_v16, 0.0 }
  0xa1   :  { %39 = vadd.xlane.f32.xlu0 %v38_v19 }
  0xa3   :  { %v144_v21 = vpop.eup %143 }
  0xa4   :  { %v41_v22 = vsel %vm25_vm0, %v144_v21, 0.0 }
  0xa5   :  { %63 = vadd.xlane.f32.xlu0 %v62_v20  ;;  %42 = vadd.xlane.f32.xlu1 %v41_v22 }
  0xa9   :  { %66 = vadd.xlane.f32.xlu0 %v65_v24 }
  0xad   :  { %69 = vadd.xlane.f32.xlu0 %v68_v25 }
  0xb1   :  { %72 = vadd.xlane.f32.xlu0 %v71_v26 }
  0xb5   :  { %80 = vadd.xlane.f32.xlu0 %v79_v28 }
  0xb9   :  { %83 = vadd.xlane.f32.xlu0 %v82_v30 }
 0x12e   :  { %v40_v31 = vpop.xlane.xlu0 %39 }
 0x12f   :  { %145 = vlog2.f32 %v40_v31 }
 0x132   :  { %v43_v32 = vpop.xlane.xlu1 %42  ;;  %v64_v33 = vpop.xlane.xlu0 %63 }
 0x133   :  { %147 = vlog2.f32 %v43_v32 }
 0x136   :  { %v67_v34 = vpop.xlane.xlu0 %66 }
 0x139   :  { %v146_v35 = vpop.eup %145 }
 0x13a   :  { %v45_v36 = vmul.f32 0.6931472, %v146_v35  ;;  %v70_v37 = vpop.xlane.xlu0 %69 }
 0x13b   :  { %v85_v42 = vsub.f32 %v70_v37, %v64_v33 }
 0x13c   :  { %v48_v39 = vadd.f32 %v45_v36, %v28_v7 }
 0x13d   :  { %v148_v38 = vpop.eup %147 }
 0x13e   :  { %v73_v40 = vpop.xlane.xlu0 %72  ;;  %v47_v41 = vmul.f32 0.6931472, %v148_v38  ;;  %v74_v43 = vsub.f32 %v64_v33, %v48_v39  ;;  %v89_v46 = vmul.f32 30.0, %v48_v39 }
 0x13f   :  { %v86_v48 = vsub.f32 %v73_v40, %v67_v34 }
 0x140   :  { %v49_v45 = vadd.f32 %v47_v41, %v31_v10  ;;  %v93_v50 = vmul.f32 0.9, %v74_v43 }
 0x142   :  { %v81_v44 = vpop.xlane.xlu0 %80  ;;  %v75_v52 = vsub.f32 %v67_v34, %v49_v45  ;;  %v90_v54 = vmul.f32 30.0, %v49_v45 }
 0x143   :  { %v87_v47 = vsub.f32 %v85_v42, %v81_v44 }
 0x144   :  { %v94_v58 = vmul.f32 0.9, %v75_v52 }
 0x145   :  { %v91_v49 = vsub.f32 %v87_v47, %v89_v46 }
 0x146   :  { %v84_v51 = vpop.xlane.xlu0 %83 }
 0x147   :  { %v95_v53 = vmul.f32 0.0033333334, %v91_v49  ;;  %v88_v55 = vsub.f32 %v86_v48, %v84_v51 }
 0x149   :  { %v97_v56 = vadd.f32 %v95_v53, %v93_v50  ;;  %v92_v57 = vsub.f32 %v88_v55, %v90_v54 }
 0x14b   :  { %v96_v59 = vmul.f32 0.0033333334, %v92_v57  ;;  %v103_v60 = vsub.f32 -0.66520274, %v97_v56 }
 0x14d   :  { %v98_v61 = vadd.f32 %v96_v59, %v94_v58  ;;  %v105_v63 = vsel %vm99_vm4, %v103_v60, 0.0 }
 0x14e   :  { %v108_v1 = vsel %vm107_vm6, %v105_v63, 0.0 }
 0x14f   :  { %v104_v62 = vsub.f32 -0.66520274, %v98_v61 }
 0x151   :  { %v106_v0 = vsel %vm100_vm5, %v104_v62, 0.0 }
 0x152   :  { %v109_v3 = vsel %vm107_vm6, %v106_v0, 0.0 }
 0x153   :  { %v110_v4 = vadd.f32 %v109_v3, %v108_v1 }
 0x155   :  { %111 = vadd.xlane.f32.xlu0 %v110_v4 }
 0x1e2   :  { %v112_v5 = vpop.xlane.xlu0 %111 }
 0x1e3   :  { %v113_v7 = vrot.slane %v112_v5, 4 }
 0x1e5   :  { %v114_v8 = vadd.f32 %v113_v7, %v112_v5 }
 0x1e7   :  { %v115_v9 = vrot.slane %v114_v8, 2 }
 0x1e9   :  { %v116_v10 = vadd.f32 %v115_v9, %v114_v8 }
 0x1eb   :  { %v117_v11 = vrot.slane %v116_v10, 1 }
 0x1ed   :  { %v118_v12 = vadd.f32 %v117_v11, %v116_v10 }
 0x1ef   :  { %135 = vpush %v118_v12 }
 0x220   :  { %s136_s0 = spop %135 }
 0x221   :  { %121 = sst [smem:[#allocation2]] %s136_s0 }
 0x222   :  { %158 = shalt.err (!%p155_p2)
}
 0x223   :  { %s162_s23 = smov [#allocation2]  }
 0x224   :  { %129 = dma.smem_to_hbm %s162_s23, 16, %s222_s2, [#allocation3]  }
 0x225   :  { %159 = dma.done.wait [#allocation3], 16  }
 0x226   :  { %160 = vsyncadd [#allocation3], 4294967280 }
 0x227   :  { %133 = sfence }
 0x228   :  { %134 = vsyncpa [#allocation3], 1 }

</bundles_post_ra>
